<compile_context>
chip_gen: v5e
topology: v5e:2x2
jax: 0.10.0
libtpu: 0.0.40
codegen_flags: <defaults>
</compile_context>

<pallas_src>
import functools

import jax
import jax.numpy as jnp
from jax.experimental import pallas as pl
from jax.experimental.pallas import tpu as pltpu

_LANE = 128  # lane width of the partial-sum output rows (also the head-slice width)


def _contrastive_loss_kernel(x_ref, o_ref, *, batch_size):
    i = pl.program_id(0)
    xb = x_ref[...]                                   # (TB, N), native dtype
    tb, n = xb.shape
    head_n = n if n < _LANE else _LANE                # static

    # Row-validity mask: handles the trailing partial batch tile (B % TB != 0).
    # Padded rows may contain garbage/NaN, but every reduction below is
    # per-row (axis=-1), so they cannot contaminate valid rows; the final
    # per-row where() zeroes their contribution.
    row = i * tb + jax.lax.broadcasted_iota(jnp.int32, (tb, 1), 0)       # (TB, 1)
    valid = row < batch_size

    # Head slice (lane-aligned, contains column 0): positive logit + column-0
    # exclusion.  Only head_n <= 128 lanes pay for the iota/select work.
    head = xb[:, :head_n].astype(jnp.float32)                            # (TB, head_n)
    col = jax.lax.broadcasted_iota(jnp.int32, (tb, head_n), 1)
    pos = jnp.sum(jnp.where(col == 0, head, 0.0), axis=-1, keepdims=True)   # (TB, 1)
    head_neg = jnp.where(col >= 1, head, -jnp.inf)                       # col 0 -> -inf

    m = jnp.max(head_neg, axis=-1, keepdims=True)                        # (TB, 1)
    if n > head_n:
        # Columns >= 128 are always negatives: reduce them unmasked.
        tail = xb[:, head_n:].astype(jnp.float32)                        # (TB, n-128)
        m = jnp.maximum(m, jnp.max(tail, axis=-1, keepdims=True))
        s = (jnp.sum(jnp.exp(head_neg - m), axis=-1, keepdims=True)
             + jnp.sum(jnp.exp(tail - m), axis=-1, keepdims=True))
    else:
        s = jnp.sum(jnp.exp(head_neg - m), axis=-1, keepdims=True)

    lse = m + jnp.log(s)                                                 # (TB, 1)
    loss = jnp.where(valid, lse - pos, 0.0)                              # gate padded rows
    tile_sum = jnp.sum(loss)                                             # scalar partial

    # Lane-dense (1, 128) output block; wrapper reads lane 0 of each tile row.
    o_ref[...] = jnp.broadcast_to(tile_sum, o_ref.shape)


def _vmem_capacity_bytes():
    """Physical per-core VMEM; conservative (v7x) fallback if the query fails."""
    try:
        info = pltpu.get_tpu_info()
        cap = int(getattr(info, "vmem_capacity_bytes", 0))
        if cap > 0:
            return cap
    except Exception:
        pass
    return 64 << 20


def _pick_batch_tile(batch, n, itemsize, vmem_budget, target_bytes=12 << 20):
    """Largest batch tile such that
       (a) it is a multiple of the sublane pack,
       (b) the input block is ~target_bytes (HBM-stream amortization of the
           ~0.35 us per-grid-step overhead),
       (c) double-buffered input + ~3 full-width f32 temporaries fit the
           generation's VMEM budget,
       (d) the grid has >= 2 steps for non-tiny inputs (v7x 2-TC sharding)."""
    pack = max(8, 32 // itemsize)            # 8 for f32, 16 for bf16, 32 for int8/fp8
    if batch <= pack:
        return batch                         # block dim == full array dim (always legal)
    row_in = n * itemsize
    row_vmem = 2 * row_in + 3 * n * 4        # double-buffered input + f32 temporaries
    tb_vmem = max(pack, (vmem_budget // max(1, row_vmem)) // pack * pack)
    tb_tgt = max(pack, (target_bytes // max(1, row_in)) // pack * pack)
    tb = min(tb_vmem, tb_tgt)
    if batch * row_in > (4 << 20):
        # Keep at least 2 grid steps so the "parallel" axis can span both TCs.
        half = max(pack, (pl.cdiv(batch, 2) // pack) * pack)
        tb = min(tb, half)
    return min(tb, (batch // pack) * pack)


def contrastive_loss(x, labels=None):
    """x: (B, N) array (any float dtype); col 0 = positive logit, cols 1..N-1 =
    negatives.  Returns scalar float32 batch-mean loss.  `labels` is unused."""
    B, N = x.shape
    itemsize = jnp.dtype(x.dtype).itemsize

    physical_vmem = _vmem_capacity_bytes()
    vmem_budget = int(0.7 * physical_vmem)          # ~89 MiB on v5e/v6e, ~44 MiB on v7x

    tb = _pick_batch_tile(B, N, itemsize, vmem_budget)
    num_tiles = pl.cdiv(B, tb)

    block_bytes = tb * N * itemsize
    need = 2 * block_bytes + 3 * tb * N * 4 + (2 << 20)
    vmem_limit = int(min(vmem_budget, max(16 << 20, need)))

    cost = pl.CostEstimate(
        flops=int(5 * B * N),
        transcendentals=int(B * N),
        bytes_accessed=int(B * N * itemsize + num_tiles * _LANE * 4),
    )

    partials = pl.pallas_call(
        functools.partial(_contrastive_loss_kernel, batch_size=B),
        out_shape=jax.ShapeDtypeStruct((num_tiles, _LANE), jnp.float32),
        grid_spec=pltpu.PrefetchScalarGridSpec(
            num_scalar_prefetch=0,
            grid=(num_tiles,),
            in_specs=[pl.BlockSpec((tb, N), lambda i: (i, 0))],
            out_specs=pl.BlockSpec((1, _LANE), lambda i: (i, 0)),
        ),
        compiler_params=pltpu.CompilerParams(
            dimension_semantics=("parallel",),   # independent tiles -> megacore-friendly
            vmem_limit_bytes=vmem_limit,
        ),
        cost_estimate=cost,
    )(x)   # native dtype in; the f32 cast happens in-register inside the kernel

    return jnp.sum(partials[:, 0]) / B


if __name__ == "__main__":
    key = jax.random.PRNGKey(0)

    def ref_loss(xx):
        x32 = xx.astype(jnp.float32)
        return jnp.mean(-x32[:, 0] + jnp.log(jnp.sum(jnp.exp(x32[:, 1:]), axis=-1)))

    k1, k2, k3 = jax.random.split(key, 3)

    # 1) Shape implied by the module: batch 8, 1 positive + 127 negative logits.
    x1 = jax.random.normal(k1, (8, 128), dtype=jnp.float32)
    labels = jax.random.randint(k2, (8,), 0, 128)   # unused, matches module signature
    out1 = contrastive_loss(x1, labels)
    jax.block_until_ready(out1)
    r1 = ref_loss(x1)
    assert jnp.allclose(out1, r1, rtol=1e-5, atol=1e-5), (out1, r1)

    # 2) Batch not a multiple of the tile AND N > 128 -> exercises multi-step grid,
    #    padded-row masking (without a full-width validity select), and the
    #    head/tail split reduction.
    x2 = jax.random.normal(k3, (37, 256), dtype=jnp.float32)
    out2 = contrastive_loss(x2)
    jax.block_until_ready(out2)
    r2 = ref_loss(x2)
    assert jnp.allclose(out2, r2, rtol=1e-5, atol=1e-5), (out2, r2)

    # 3) Native bf16 input: no wrapper-side upcast (half the HBM bytes).
    x3 = jax.random.normal(k2, (16, 128), dtype=jnp.bfloat16)
    out3 = contrastive_loss(x3)
    jax.block_until_ready(out3)
    r3 = ref_loss(x3)
    assert jnp.allclose(out3, r3, rtol=1e-4, atol=1e-4), (out3, r3)

    print("KERNEL_OK")
</pallas_src>

<mosaic_0001>
module attributes {stable_mosaic.version = 11 : i64} {
  func.func @_contrastive_loss_kernel(%arg0: i32, %arg1: memref<8x128xf32, #tpu.memory_space<vmem>>, %arg2: memref<1x128xf32, #tpu.memory_space<vmem>>) attributes {dimension_semantics = [#tpu.dimension_semantics<parallel>], iteration_bounds = array<i64: 1>, scalar_prefetch = 0 : i64, scratch_operands = 0 : i64, tpu.core_type = #tpu.core_type<tc>, window_params = [{transform_indices = @transform_0, window_bounds = array<i64: 8, 128>}, {transform_indices = @transform_1, window_bounds = array<i64: 1, 128>}]} {
    %c0 = arith.constant 0 : index
    %c0_0 = arith.constant 0 : index
    %0 = vector.load %arg1[%c0, %c0_0] : memref<8x128xf32, #tpu.memory_space<vmem>>, vector<8x128xf32>
    %c8_i32 = arith.constant 8 : i32
    %1 = arith.muli %arg0, %c8_i32 : i32
    %2 = tpu.iota {dimensions = array<i32: 0>} : vector<8x1xi32>
    %3 = vector.broadcast %1 : i32 to vector<8x1xi32>
    %4 = arith.addi %3, %2 : vector<8x1xi32>
    %c8_i32_1 = arith.constant 8 : i32
    %5 = vector.broadcast %c8_i32_1 : i32 to vector<8x1xi32>
    %6 = arith.cmpi slt, %4, %5 : vector<8x1xi32>
    %7 = tpu.iota {dimensions = array<i32: 1>} : vector<8x128xi32>
    %c0_i32 = arith.constant 0 : i32
    %8 = vector.broadcast %c0_i32 : i32 to vector<8x128xi32>
    %9 = arith.cmpi eq, %7, %8 : vector<8x128xi32>
    %cst = arith.constant 0.000000e+00 : f32
    %10 = vector.broadcast %cst : f32 to vector<8x128xf32>
    %11 = arith.select %9, %0, %10 : vector<8x128xi1>, vector<8x128xf32>
    %cst_2 = arith.constant dense<0.000000e+00> : vector<8xf32>
    %12 = vector.multi_reduction <add>, %11, %cst_2 [1] : vector<8x128xf32> to vector<8xf32>
    %13 = vector.shape_cast %12 : vector<8xf32> to vector<8x1xf32>
    %c1_i32 = arith.constant 1 : i32
    %14 = vector.broadcast %c1_i32 : i32 to vector<8x128xi32>
    %15 = arith.cmpi sge, %7, %14 : vector<8x128xi32>
    %cst_3 = arith.constant 0xFF800000 : f32
    %16 = vector.broadcast %cst_3 : f32 to vector<8x128xf32>
    %17 = arith.select %15, %0, %16 : vector<8x128xi1>, vector<8x128xf32>
    %cst_4 = arith.constant dense<0xFF800000> : vector<8xf32>
    %18 = vector.multi_reduction <maximumf>, %17, %cst_4 [1] : vector<8x128xf32> to vector<8xf32>
    %19 = vector.shape_cast %18 : vector<8xf32> to vector<8x1xf32>
    %20 = vector.broadcast %19 : vector<8x1xf32> to vector<8x128xf32>
    %21 = arith.subf %17, %20 : vector<8x128xf32>
    %22 = math.exp %21 : vector<8x128xf32>
    %cst_5 = arith.constant dense<0.000000e+00> : vector<8xf32>
    %23 = vector.multi_reduction <add>, %22, %cst_5 [1] : vector<8x128xf32> to vector<8xf32>
    %24 = vector.shape_cast %23 : vector<8xf32> to vector<8x1xf32>
    %25 = math.log %24 : vector<8x1xf32>
    %26 = arith.addf %19, %25 : vector<8x1xf32>
    %27 = arith.subf %26, %13 : vector<8x1xf32>
    %cst_6 = arith.constant 0.000000e+00 : f32
    %28 = vector.broadcast %cst_6 : f32 to vector<8x1xf32>
    %29 = arith.select %6, %27, %28 : vector<8x1xi1>, vector<8x1xf32>
    %30 = vector.shape_cast %29 : vector<8x1xf32> to vector<1x8x1xf32>
    %cst_7 = arith.constant dense<0.000000e+00> : vector<1xf32>
    %31 = vector.multi_reduction <add>, %30, %cst_7 [1, 2] : vector<1x8x1xf32> to vector<1xf32>
    %32 = vector.shape_cast %31 : vector<1xf32> to vector<1x1x1xf32>
    %33 = vector.extract %32[0, 0, 0] : f32 from vector<1x1x1xf32>
    %34 = vector.broadcast %33 : f32 to vector<1x128xf32>
    %c0_8 = arith.constant 0 : index
    %c0_9 = arith.constant 0 : index
    %35 = vector.load %arg2[%c0_8, %c0_9] : memref<1x128xf32, #tpu.memory_space<vmem>>, vector<1x128xf32>
    tpu.vector_store %arg2[%c0_8, %c0_9], %34 {strides = array<i32>} : memref<1x128xf32, #tpu.memory_space<vmem>>, vector<1x128xf32>,
    return
  }
  func.func @transform_0(%arg0: i32) -> (i32, i32) {
    %c0_i32 = arith.constant 0 : i32
    %c0_i32_0 = arith.constant 0 : i32
    return %arg0, %c0_i32 : i32, i32
  }
  func.func @transform_1(%arg0: i32) -> (i32, i32) {
    %c0_i32 = arith.constant 0 : i32
    %c0_i32_0 = arith.constant 0 : i32
    return %arg0, %c0_i32 : i32, i32
  }
}

</mosaic_0001>

<bundles_post_ra>
// kernel: tpu_custom_call.1
= control target key start
LH: loop header
LB: loop body
LE: loop exit
PB: predicated region body
PF: predicated region fallthrough
CT: control target
= control target key end

     0   :  { %6 = vsyncpa [#allocation3], 0  ;;  %s158_s0 = inlined_call_operand.hbm [shape: f32[8,128], index: 0, kind: input, shape index: {}]   ;;  %s159_s1 = inlined_call_operand.hbm [shape: f32[1,128], index: 1, kind: output, shape index: {}]  }
   0x1   :  { %7 = vsyncpa [#allocation4], 0  ;;  %s13_s8 = sshll.u32 %s158_s0, 4  ;;  %s140_s9 = smov [#allocation2]   ;;  %s14_s8 = int_to_ptr.hbm [resolvable:$true] %s13_s8 }
   0x2   :  { %s15_s10 = sshll.u32 %s140_s9, 4  ;;  %s16_s10 = int_to_ptr.vmem [resolvable:$true] %s15_s10 }
   0x3   :  { %18 = dma.hbm_to_vmem [thread:$0]  %s14_s8, 128, %s16_s10, [#allocation3]  }
   0x4   :  { %136 = dma.done.wait [#allocation3], 128  }
   0x5   :  { %137 = vsyncadd [#allocation3], 4294967168  ;;  %v30_v0 = vlaneseq  ;;  %v23_v2 = vld [vmem:[#allocation2] sm:$0xff]  ;;  %vm50_vm2 = vcmask 7168   ;;  %s141_s0 = smov [#allocation5]   ;;  %s70_s14 = sshll.u32 %s159_s1, 4  ;;  %s71_s14 = int_to_ptr.hbm [resolvable:$true] %s70_s14 }
   0x6   :  { %s68_s11 = sshll.u32 %s141_s0, 4  ;;  %s69_s11 = int_to_ptr.vmem [resolvable:$true] %s68_s11 }
   0x7   :  { %v31_v1 = vand.u32 127, %v30_v0 }
   0x9   :  { %vm36_vm0 = vcmp.ge.s32.totalorder %v31_v1, 1  ;;  %vm32_vm1 = vcmp.eq.s32.totalorder %v31_v1, 0 }
   0xa   :  { %v37_v3 = vsel %vm36_vm0, %v23_v2, -inf  ;;  %v33_v4 = vsel %vm32_vm1, %v23_v2, 0.0 }
   0xb   :  { %38 = vmax.xlane.f32.xlu0 %v37_v3  ;;  %34 = vadd.xlane.f32.xlu1 %v33_v4 }
  0x7e   :  { %v39_v5 = vpop.xlane.xlu0 %38  ;;  %v35_v12 = vpop.xlane.xlu1 %34 }
  0x7f   :  { %v40_v6 = vsub.f32 %v37_v3, %v39_v5 }
  0x81   :  { %v41_v7 = vmul.f32 1.442695, %v40_v6 }
  0x83   :  { %84 = vpow2.f32 %v41_v7 }
  0x89   :  { %v85_v8 = vpop.eup %84 }
  0x8a   :  { %43 = vadd.xlane.f32.xlu0 %v85_v8 }
  0xfd   :  { %v44_v9 = vpop.xlane.xlu0 %43 }
  0xfe   :  { %86 = vlog2.f32 %v44_v9 }
 0x104   :  { %v87_v10 = vpop.eup %86 }
 0x105   :  { %v46_v11 = vmul.f32 0.6931472, %v87_v10 }
 0x107   :  { %v47_v13 = vadd.f32 %v46_v11, %v39_v5 }
 0x109   :  { %v48_v14 = vsub.f32 %v47_v13, %v35_v12 }
 0x10b   :  { %v51_v15 = vsel %vm50_vm2, %v48_v14, 0.0 }
 0x10c   :  { %52 = vadd.xlane.f32.xlu1 %v51_v15 }
 0x17f   :  { %v53_v16 = vpop.xlane.xlu1 %52 }
 0x180   :  { %v54_v17 = vrot.slane %v53_v16, 4 }
 0x182   :  { %v55_v18 = vadd.f32 %v54_v17, %v53_v16 }
 0x184   :  { %v56_v19 = vrot.slane %v55_v18, 2 }
 0x186   :  { %v57_v20 = vadd.f32 %v56_v19, %v55_v18 }
 0x188   :  { %v58_v21 = vrot.slane %v57_v20, 1 }
 0x18a   :  { %v59_v22 = vadd.f32 %v58_v21, %v57_v20 }
 0x18c   :  { %80 = vpush %v59_v22 }
 0x1bd   :  { %s81_s15 = spop %80 }
 0x1be   :  { %v61_v23 = vstv %s81_s15 }
 0x1bf   :  { %62 = vst [vmem:[#allocation5] sm:$0x1] %v61_v23 }
 0x1c0   :  { %73 = dma.vmem_to_hbm [thread:$0]  %s69_s11, 16, %s71_s14, [#allocation4]  }
 0x1c1   :  { %138 = dma.done.wait [#allocation4], 16  }
 0x1c2   :  { %139 = vsyncadd [#allocation4], 4294967280 }
 0x1c3   :  { %78 = vsyncpa [#allocation3], 1 }
 0x1c4   :  { %79 = vsyncpa [#allocation4], 1 }

</bundles_post_ra>
